<compile_context>
chip_gen: v7x
topology: tpu7x:2x2x1
jax: 0.10.0
libtpu: 0.0.40
codegen_flags: <defaults>
</compile_context>

<pallas_src>
import jax
import jax.numpy as jnp
from jax.experimental import pallas as pl
from jax.experimental.pallas import tpu as pltpu

_LANE = 128
_SUBLANE = 8


def _round_up(x, m):
    return ((x + m - 1) // m) * m


def _pick_n_tile(n):
    """Pick tn from {128, 256, 512} minimizing N padding (larger tile on ties)."""
    best_t, best_pad = 128, _round_up(n, 128)
    for t in (256, 512):
        pad = _round_up(n, t)
        if pad < best_pad or (pad == best_pad and t > best_t):
            best_t, best_pad = t, pad
    return best_t


def _vmem_limit_bytes():
    try:
        cap = pltpu.get_tpu_info().vmem_capacity_bytes
    except Exception:
        cap = 64 * 1024 * 1024  # assume the smallest (v7x) if the query is unavailable
    # ~3/4 of physical: 48 MiB on v7x (64 MiB), 96 MiB on v5e/v6e (128 MiB).
    return int(min(3 * cap // 4, 96 * 1024 * 1024))


_VMEM_LIMIT = _vmem_limit_bytes()


def _linear_fused_kernel(x_ref, w_ref, b_ref, o_ref):
    # x_ref: (tm, K) bf16   w_ref: (K, tn) bf16 (pre-transposed)   b_ref: (1, tn) f32
    # Single-shot K: one MXU pass, bias add + cast fused, no scratch.
    acc = jnp.dot(x_ref[...], w_ref[...], preferred_element_type=jnp.float32)
    o_ref[...] = (acc + b_ref[...]).astype(o_ref.dtype)


def _linear_acc_kernel(x_ref, w_ref, b_ref, o_ref, acc_ref):
    # Large-K path: K is the last ("arbitrary") grid axis, f32 accumulator scratch.
    k = pl.program_id(2)
    prod = jnp.dot(x_ref[...], w_ref[...], preferred_element_type=jnp.float32)

    @pl.when(k == 0)
    def _init():
        acc_ref[...] = prod  # init with the first product: no zero-fill store

    @pl.when(k > 0)
    def _accum():
        acc_ref[...] += prod

    @pl.when(k == pl.num_programs(2) - 1)
    def _finalize():
        o_ref[...] = (acc_ref[...] + b_ref[...]).astype(o_ref.dtype)


@jax.jit
def dummy_module_forward(x, weight, bias):
    """DummyModule(model)(x) with model = nn.Linear(in_features, out_features).

    x:      (B, S, H)                    (any float dtype)
    weight: (out_features, in_features)  PyTorch nn.Linear layout
    bias:   (out_features,)
    returns (B, S, out_features) in x.dtype
    """
    B, S, H = x.shape
    N_out, K_in = weight.shape
    M = B * S
    out_dtype = x.dtype

    # Fast path: shapes too small / ragged for the MXU kernel to pay off.
    if N_out < _LANE or K_in < _LANE or M * N_out * K_in < (1 << 21):
        out2d = x.reshape(M, K_in) @ weight.T + bias
        return out2d.reshape(B, S, N_out).astype(out_dtype)

    # ---- tile selection ----
    tn = _pick_n_tile(N_out)
    Np = _round_up(N_out, tn)
    tm = min(512, _round_up(M, _SUBLANE))
    Mp = _round_up(M, tm)
    # v7x has 2 TensorCores: guarantee >= 2 parallel output tiles when feasible.
    if (Mp // tm) * (Np // tn) < 2:
        half = _round_up(max(tm // 2, _SUBLANE), _SUBLANE)
        if _round_up(M, half) // half >= 2:
            tm = half
            Mp = _round_up(M, tm)

    Kp = _round_up(K_in, _LANE)
    collapse_k = Kp <= 2048
    if collapse_k:
        tk = Kp
    else:
        tk = 1024
        Kp = _round_up(K_in, tk)

    # ---- operand prep: bf16 MXU inputs; pad only when actually ragged ----
    # NOTE: compute is bf16 with f32 accumulation (not bit-identical to a pure
    # f32 nn.Linear); keep an f32 path here if exact parity is required.
    x2d = x.reshape(M, K_in).astype(jnp.bfloat16)
    if (Mp, Kp) != (M, K_in):
        x2d = jnp.zeros((Mp, Kp), jnp.bfloat16).at[:M, :K_in].set(x2d)

    # One-time (K, N) transpose in the wrapper -- reused by every M tile, so the
    # kernel needs no per-tile weight transpose.
    wT = weight.astype(jnp.bfloat16).T
    if (Kp, Np) != (K_in, N_out):
        wT = jnp.zeros((Kp, Np), jnp.bfloat16).at[:K_in, :N_out].set(wT)

    b2d = bias.astype(jnp.float32).reshape(1, N_out)
    if Np != N_out:
        b2d = jnp.zeros((1, Np), jnp.float32).at[:, :N_out].set(b2d)

    cost = pl.CostEstimate(
        flops=2 * M * N_out * K_in,
        transcendentals=0,
        bytes_accessed=(M * K_in + N_out * K_in) * 2      # bf16 activations / weights
        + N_out * 4                                        # f32 bias
        + M * N_out * jnp.dtype(out_dtype).itemsize)       # output

    if collapse_k:
        grid_spec = pltpu.PrefetchScalarGridSpec(
            num_scalar_prefetch=0,
            grid=(Mp // tm, Np // tn),
            in_specs=[
                pl.BlockSpec((tm, Kp), lambda i, j: (i, 0)),   # x tile (full K)
                pl.BlockSpec((Kp, tn), lambda i, j: (0, j)),   # W^T tile (full K)
                pl.BlockSpec((1, tn), lambda i, j: (0, j)),    # bias tile
            ],
            out_specs=pl.BlockSpec((tm, tn), lambda i, j: (i, j)),
        )
        kernel = _linear_fused_kernel
        dims = ("parallel", "parallel")
    else:
        grid_spec = pltpu.PrefetchScalarGridSpec(
            num_scalar_prefetch=0,
            grid=(Mp // tm, Np // tn, Kp // tk),
            in_specs=[
                pl.BlockSpec((tm, tk), lambda i, j, k: (i, k)),  # x tile
                pl.BlockSpec((tk, tn), lambda i, j, k: (k, j)),  # W^T tile
                pl.BlockSpec((1, tn), lambda i, j, k: (0, j)),   # bias tile
            ],
            out_specs=pl.BlockSpec((tm, tn), lambda i, j, k: (i, j)),
            scratch_shapes=[pltpu.VMEM((tm, tn), jnp.float32)],
        )
        kernel = _linear_acc_kernel
        dims = ("parallel", "parallel", "arbitrary")

    out2d = pl.pallas_call(
        kernel,
        out_shape=jax.ShapeDtypeStruct((Mp, Np), out_dtype),
        grid_spec=grid_spec,
        compiler_params=pltpu.CompilerParams(
            dimension_semantics=dims,
            vmem_limit_bytes=_VMEM_LIMIT,
        ),
        cost_estimate=cost,
    )(x2d, wT, b2d)

    if (Mp, Np) != (M, N_out):
        out2d = out2d[:M, :N_out]
    return out2d.reshape(B, S, N_out)


if __name__ == "__main__":
    key = jax.random.PRNGKey(0)
    kx, kw, kb, kx2, kw2, kb2 = jax.random.split(key, 6)

    # --- Pallas path: small but MXU-friendly shapes (batch=2, seq=64, hidden=256) ---
    B, S, H = 2, 64, 256
    x = jax.random.normal(kx, (B, S, H), dtype=jnp.float32)
    weight = jax.random.normal(kw, (H, H), dtype=jnp.float32) * 0.02
    bias = jax.random.normal(kb, (H,), dtype=jnp.float32) * 0.01

    out = jax.block_until_ready(dummy_module_forward(x, weight, bias))
    ref = (x.reshape(-1, H) @ weight.T + bias).reshape(B, S, H)
    assert out.shape == ref.shape and out.dtype == ref.dtype
    # bf16 MXU inputs + f32 accumulation -> loose tolerance vs full-f32 reference.
    assert jnp.allclose(out, ref, atol=1e-2, rtol=1e-2), "Pallas path mismatch"

    # --- XLA fallback path: tiny hidden size (batch=2, seq=8, hidden=32) ---
    b, s, h = 2, 8, 32
    x_s = jax.random.normal(kx2, (b, s, h), dtype=jnp.float32)
    w_s = jax.random.normal(kw2, (h, h), dtype=jnp.float32) * 0.02
    b_s = jax.random.normal(kb2, (h,), dtype=jnp.float32) * 0.01
    out_s = jax.block_until_ready(dummy_module_forward(x_s, w_s, b_s))
    ref_s = (x_s.reshape(-1, h) @ w_s.T + b_s).reshape(b, s, h)
    assert jnp.allclose(out_s, ref_s, atol=1e-4, rtol=1e-4), "fallback path mismatch"

    print("KERNEL_OK")
</pallas_src>

<mosaic_0001>
module attributes {stable_mosaic.version = 11 : i64} {
  func.func @_linear_fused_kernel(%arg0: i32, %arg1: i32, %arg2: memref<64x256xbf16, #tpu.memory_space<vmem>>, %arg3: memref<256x256xbf16, #tpu.memory_space<vmem>>, %arg4: memref<1x256xf32, #tpu.memory_space<vmem>>, %arg5: memref<64x256xf32, #tpu.memory_space<vmem>>) attributes {dimension_semantics = [#tpu.dimension_semantics<parallel>, #tpu.dimension_semantics<parallel>], iteration_bounds = array<i64: 2, 1>, scalar_prefetch = 0 : i64, scratch_operands = 0 : i64, tpu.core_type = #tpu.core_type<tc>, window_params = [{transform_indices = @transform_0, window_bounds = array<i64: 64, 256>}, {transform_indices = @transform_1, window_bounds = array<i64: 256, 256>}, {transform_indices = @transform_2, window_bounds = array<i64: 1, 256>}, {transform_indices = @transform_3, window_bounds = array<i64: 64, 256>}]} {
    %c0 = arith.constant 0 : index
    %c0_0 = arith.constant 0 : index
    %0 = vector.load %arg2[%c0, %c0_0] : memref<64x256xbf16, #tpu.memory_space<vmem>>, vector<64x256xbf16>
    %c0_1 = arith.constant 0 : index
    %c0_2 = arith.constant 0 : index
    %1 = vector.load %arg3[%c0_1, %c0_2] : memref<256x256xbf16, #tpu.memory_space<vmem>>, vector<256x256xbf16>
    %cst = arith.constant dense<0.000000e+00> : vector<64x256xf32>
    %2 = tpu.matmul %0, %1, %cst {dimension_numbers = #tpu.dot_dimension_numbers<[1], [0], [0], [1], [0, 0, 1, 1], [], []>} : vector<64x256xbf16>, vector<256x256xbf16>, vector<64x256xf32> -> vector<64x256xf32>
    %c0_3 = arith.constant 0 : index
    %c0_4 = arith.constant 0 : index
    %3 = vector.load %arg4[%c0_3, %c0_4] : memref<1x256xf32, #tpu.memory_space<vmem>>, vector<1x256xf32>
    %4 = vector.broadcast %3 : vector<1x256xf32> to vector<64x256xf32>
    %5 = arith.addf %2, %4 : vector<64x256xf32>
    %c0_5 = arith.constant 0 : index
    %c0_6 = arith.constant 0 : index
    %6 = vector.load %arg5[%c0_5, %c0_6] : memref<64x256xf32, #tpu.memory_space<vmem>>, vector<64x256xf32>
    tpu.vector_store %arg5[%c0_5, %c0_6], %5 {strides = array<i32>} : memref<64x256xf32, #tpu.memory_space<vmem>>, vector<64x256xf32>,
    return
  }
  func.func @transform_0(%arg0: i32, %arg1: i32) -> (i32, i32) {
    %c0_i32 = arith.constant 0 : i32
    %c0_i32_0 = arith.constant 0 : i32
    return %arg0, %c0_i32 : i32, i32
  }
  func.func @transform_1(%arg0: i32, %arg1: i32) -> (i32, i32) {
    %c0_i32 = arith.constant 0 : i32
    %c0_i32_0 = arith.constant 0 : i32
    return %c0_i32, %arg1 : i32, i32
  }
  func.func @transform_2(%arg0: i32, %arg1: i32) -> (i32, i32) {
    %c0_i32 = arith.constant 0 : i32
    %c0_i32_0 = arith.constant 0 : i32
    return %c0_i32, %arg1 : i32, i32
  }
  func.func @transform_3(%arg0: i32, %arg1: i32) -> (i32, i32) {
    %c0_i32 = arith.constant 0 : i32
    return %arg0, %arg1 : i32, i32
  }
}

</mosaic_0001>

<bundles_post_ra>
// kernel: dummy_module_forward.1
= control target key start
LH: loop header
LB: loop body
LE: loop exit
PB: predicated region body
PF: predicated region fallthrough
CT: control target
= control target key end

     0   :  { %8 = vsyncpa [#allocation3], 0  ;;  %s1247_s0 = inlined_call_operand.vmem [shape: bf16[128,256], index: 0, kind: input, shape index: {}]   ;;  %s1248_s1 = inlined_call_operand.vmem [shape: bf16[256,256], index: 1, kind: input, shape index: {}]   ;;  %s1249_s2 = inlined_call_operand.vmem [shape: f32[1,256], index: 2, kind: input, shape index: {}]   ;;  %s1250_s3 = inlined_call_operand.hbm [shape: f32[128,256], index: 3, kind: output, shape index: {}]  }
   0x1   :  { %10 = vsyncpa [#allocation3 + $0x1], 0  ;;  %s1001_s12 = smov 0   ;;  %s1003_s13 = smov 0  }
   0x2   :  { %s1005_s14 = smov 0   ;;  %s1007_s15 = smov 0  }
   0x3   :  { %s1009_s16 = smov 0   ;;  %s1011_s17 = smov 0  }
   0x4 LB: > { %s689_s18 = sadd.s32 4294967295, %s976_s17   ;;  %s690_s19 = sadd.s32 4294967294, %s976_s17   ;;  %s976_s17 = sphi %s1011_s17, %s16_s17   ;;  %s972_s16 = sphi %s1009_s16, %s1257_s16   ;;  %s968_s15 = sphi %s1007_s15, %s1256_s15   ;;  %s964_s14 = sphi %s1005_s14, %s1255_s14   ;;  %s960_s13 = sphi %s1003_s13, %s1254_s13   ;;  %s956_s12 = sphi %s1001_s12, %s1253_s12  }
   0x5   : > { %s28_s20 = sadd.s32 1, %s972_s16  ;;  %s115_s21 = sadd.s32 1, %s964_s14 }
   0x6   : > { %p30_p0 = scmp.ge.s32.totalorder %s28_s20, 2  ;;  %p125_p1 = scmp.ne.s32.totalorder %s964_s14, %s960_s13 }
   0x7   : > { %p126_p2 = scmp.eq.s32.totalorder %s689_s18, 1  ;;  %p131_p3 = scmp.ne.s32.totalorder %s960_s13, %s956_s12 }
   0x8   : > { %s1259_s20 = smov (%p30_p0, %s28_s20), 0  ;;  %p132_p5 = scmp.eq.s32.totalorder %s690_s19, 1 }
   0x9   : > { %p1041_p4 = por %p126_p2, %p125_p1  ;;  %s110_s23 = ssub.s32 %s972_s16, %s1259_s20 }
   0xa   : > { %p695_p6 = scmp.ge.s32.totalorder %s976_s17, 1  ;;  %p113_p7 = scmp.eq.s32.totalorder %s110_s23, 0 }
   0xb   : > { %p1048_p8 = por %p132_p5, %p131_p3  ;;  %p177_p9 = scmp.lt.s32.totalorder %s976_s17, 3 }
   0xc   : > { %s1054_s25 = scalar_select %p113_p7, %s964_s14, %s115_s21  }
   0xd   : > { %p178_p10 = pnand %p695_p6, %p177_p9 }
   0xe   : > { %v838_v0 = vld [vmem:[%s1248_s1 + $0x4] ss:$8 sps:$4 sm:$0xff] (!%p178_p10)   ;;  %v840_v1 = vld [vmem:[%s1248_s1] ss:$8 sps:$4 sm:$0xff] (!%p178_p10)   ;;  %v841_v2 = vld [vmem:[%s1248_s1 + $0x14] ss:$8 sps:$4 sm:$0xff] (!%p178_p10)   ;;  %v273_v40 = vlaneseq (!%p178_p10) }
   0xf   : > { %181 = sbr.rel (%p178_p10) target bundleno = 319 (0x13f), region = 32  ;;  %483 = vmatprep.subr.bf16.mxu0 (!%p178_p10), %v838_v0  ;;  %749 = vmatprep.subr.bf16.mxu1 (!%p178_p10), %v838_v0  ;;  %v843_v3 = vld [vmem:[%s1248_s1 + $0x10] ss:$8 sps:$4 sm:$0xff] (!%p178_p10)   ;;  %v844_v4 = vld [vmem:[%s1248_s1 + $0x24] ss:$8 sps:$4 sm:$0xff] (!%p178_p10)   ;;  %s697_s9 = sshll.u32 (!%p178_p10), %s968_s15, 3 }
  0x10   : > { %484 = vmatpush1.bf16.msra.mxu0 (!%p178_p10), %v840_v1  ;;  %765 = vmatpush1.bf16.msra.mxu1 (!%p178_p10), %v840_v1  ;;  %v846_v5 = vld [vmem:[%s1248_s1 + $0x20] ss:$8 sps:$4 sm:$0xff] (!%p178_p10)   ;;  %v847_v6 = vld [vmem:[%s1248_s1 + $0x34] ss:$8 sps:$4 sm:$0xff] (!%p178_p10)   ;;  %p212_p11 = scmp.lt.s32.totalorder (!%p178_p10), %s697_s9, 15  ;;  %v274_v41 = vshrl.u32 (!%p178_p10), %v273_v40, 7 }
  0x11   : > { %485 = vmatprep.subr.bf16.mxu0 (!%p178_p10), %v841_v2  ;;  %750 = vmatprep.subr.bf16.mxu1 (!%p178_p10), %v841_v2  ;;  %v849_v7 = vld [vmem:[%s1248_s1 + $0x30] ss:$8 sps:$4 sm:$0xff] (!%p178_p10)   ;;  %v850_v8 = vld [vmem:[%s1248_s1 + $0x44] ss:$8 sps:$4 sm:$0xff] (!%p178_p10)   ;;  %v852_v9 = vld [vmem:[%s1248_s1 + $0x40] ss:$8 sps:$4 sm:$0xff] (!%p178_p10)  }
  0x12   : > { %v853_v10 = vld [vmem:[%s1248_s1 + $0x54] ss:$8 sps:$4 sm:$0xff] (!%p178_p10)   ;;  %v855_v11 = vld [vmem:[%s1248_s1 + $0x50] ss:$8 sps:$4 sm:$0xff] (!%p178_p10)   ;;  %v856_v12 = vld [vmem:[%s1248_s1 + $0x64] ss:$8 sps:$4 sm:$0xff] (!%p178_p10)  }
  0x13   : > { %v858_v14 = vld [vmem:[%s1248_s1 + $0x60] ss:$8 sps:$4 sm:$0xff] (!%p178_p10)   ;;  %v859_v16 = vld [vmem:[%s1248_s1 + $0x74] ss:$8 sps:$4 sm:$0xff] (!%p178_p10)   ;;  %v861_v17 = vld [vmem:[%s1248_s1 + $0x70] ss:$8 sps:$4 sm:$0xff] (!%p178_p10)  }
  0x14   : > { %486 = vmatpush1.bf16.msra.mxu0 (!%p178_p10), %v843_v3  ;;  %766 = vmatpush1.bf16.msra.mxu1 (!%p178_p10), %v843_v3  ;;  %v862_v18 = vld [vmem:[%s1248_s1 + $0x84] ss:$8 sps:$4 sm:$0xff] (!%p178_p10)   ;;  %v864_v19 = vld [vmem:[%s1248_s1 + $0x80] ss:$8 sps:$4 sm:$0xff] (!%p178_p10)   ;;  %v865_v20 = vld [vmem:[%s1248_s1 + $0x94] ss:$8 sps:$4 sm:$0xff] (!%p178_p10)  }
  0x15   : > { %487 = vmatprep.subr.bf16.mxu0 (!%p178_p10), %v844_v4  ;;  %751 = vmatprep.subr.bf16.mxu1 (!%p178_p10), %v844_v4  ;;  %v867_v21 = vld [vmem:[%s1248_s1 + $0x90] ss:$8 sps:$4 sm:$0xff] (!%p178_p10)   ;;  %v868_v22 = vld [vmem:[%s1248_s1 + $0xa4] ss:$8 sps:$4 sm:$0xff] (!%p178_p10)   ;;  %v870_v23 = vld [vmem:[%s1248_s1 + $0xa0] ss:$8 sps:$4 sm:$0xff] (!%p178_p10)  }
  0x16   : > { %s1261_s9 = smov (!%p212_p11, %s697_s9), 15  ;;  %v871_v24 = vld [vmem:[%s1248_s1 + $0xb4] ss:$8 sps:$4 sm:$0xff]   ;;  %v873_v25 = vld [vmem:[%s1248_s1 + $0xb0] ss:$8 sps:$4 sm:$0xff]   ;;  %v275_v42 = vsub.s32 0, %v274_v41 }
  0x17   : > { %s746_s5 = sshll.u32 %s1261_s9, 3  ;;  %v874_v26 = vld [vmem:[%s1248_s1 + $0xc4] ss:$8 sps:$4 sm:$0xff]   ;;  %v876_v27 = vld [vmem:[%s1248_s1 + $0xc0] ss:$8 sps:$4 sm:$0xff]   ;;  %s208_s29 = sand.u32 1, %s960_s13  }
  0x18   : > { %488 = vmatpush1.bf16.msra.mxu0 %v846_v5  ;;  %767 = vmatpush1.bf16.msra.mxu1 %v846_v5  ;;  %s1096_s11 = scalar_lea.vmem %s1247_s0, %s746_s5  ;;  %v877_v28 = vld [vmem:[%s1248_s1 + $0xd4] ss:$8 sps:$4 sm:$0xff]   ;;  %v879_v29 = vld [vmem:[%s1248_s1 + $0xd0] ss:$8 sps:$4 sm:$0xff]   ;;  %v880_v30 = vld [vmem:[%s1248_s1 + $0xe4] ss:$8 sps:$4 sm:$0xff]  }
  0x19   : > { %489 = vmatprep.subr.bf16.mxu0 %v847_v6  ;;  %752 = vmatprep.subr.bf16.mxu1 %v847_v6  ;;  %v888_v13 = vld [vmem:[%s1096_s11 + $0x4] ss:$8 sps:$4 sm:$0xff]   ;;  %v882_v31 = vld [vmem:[%s1248_s1 + $0xe0] ss:$8 sps:$4 sm:$0xff]   ;;  %v883_v32 = vld [vmem:[%s1248_s1 + $0xf4] ss:$8 sps:$4 sm:$0xff]  }
  0x1a   : > { %v891_v15 = vld [vmem:[%s1096_s11 + $0x24] ss:$8 sps:$4 sm:$0xff]   ;;  %515 = vmatprep.mubr.bf16.mxu0 %v888_v13  ;;  %v885_v33 = vld [vmem:[%s1248_s1 + $0xf0] ss:$8 sps:$4 sm:$0xff]   ;;  %v886_v34 = vld [vmem:[%s1096_s11] ss:$8 sps:$4 sm:$0xff]  }
  0x1b   : > { %535 = vmatprep.mubr.bf16.mxu1 %v891_v15  ;;  %v889_v35 = vld [vmem:[%s1096_s11 + $0x20] ss:$8 sps:$4 sm:$0xff]   ;;  %v892_v36 = vld [vmem:[%s1096_s11 + $0x14] ss:$8 sps:$4 sm:$0xff]   ;;  %v896_v38 = vld [vmem:[%s1096_s11 + $0x10] ss:$8 sps:$4 sm:$0xff]  }
  0x1c   : > { %490 = vmatpush1.bf16.msra.mxu0 %v849_v7  ;;  %768 = vmatpush1.bf16.msra.mxu1 %v849_v7  ;;  %v894_v37 = vld [vmem:[%s1096_s11 + $0x34] ss:$8 sps:$4 sm:$0xff]   ;;  %v897_v39 = vld [vmem:[%s1096_s11 + $0x30] ss:$8 sps:$4 sm:$0xff]   ;;  %v271_v43 = vld [vmem:[%s1249_s2] sm:$0x3] }
  0x1d   : > { %491 = vmatprep.subr.bf16.mxu0 %v850_v8  ;;  %753 = vmatprep.subr.bf16.mxu1 %v850_v8  ;;  %v279_v44 = vsub.s32 1, %v274_v41  ;;  %s696_s5 = sshll.u32 %s208_s29, 7  ;;  %v276_v45 = vrot.slane %v271_v43, %v275_v42  ;;  %s748_s6 = sshll.u32 %s968_s15, 11 }
  0x1e   : > { %s1172_s11 = scalar_lea.vmem [#allocation2], %s696_s5  ;;  %s1189_s10 = scalar_lea.hbm %s1250_s3, %s748_s6 }
  0x1f   : > { %v280_v46 = vrot.slane %v271_v43, %v279_v44  ;;  %s589_s7 = sshll.u32 %s1172_s11, 4  ;;  %s1201_s18 = scalar_lea.sflag [#allocation3], %s208_s29  ;;  %s1191_s7 = int_to_ptr.vmem [resolvable:$true] %s589_s7 }
  0x20   : > { %492 = vmatpush1.bf16.msra.mxu0 %v852_v9  ;;  %769 = vmatpush1.bf16.msra.mxu1 %v852_v9  ;;  %s898_s19 = scalar_lea.vmem %s1191_s7, 2048  ;;  %s978_s9 = smov [#allocation2]  }
  0x21   : > { %493 = vmatprep.subr.bf16.mxu0 %v853_v10  ;;  %754 = vmatprep.subr.bf16.mxu1 %v853_v10  ;;  %p899_p12 = scmp.ne.s32.totalorder %s1191_s7, %s898_s19  ;;  %s902_s21 = sshll.u32 %s978_s9, 4  ;;  %s903_s21 = int_to_ptr.vmem [resolvable:$false] %s902_s21 }
  0x22   : > { %s904_s23 = scalar_lea.vmem %s903_s21, 4096  ;;  %p905_p1 = scmp.lt.s32.totalorder %s1191_s7, %s903_s21 }
  0x23   : > { %p900_p13 = pnand %p899_p12, %p1041_p4  ;;  %p906_p2 = scmp.lt.s32.totalorder %s904_s23, %s898_s19 }
  0x24   : > { %494 = vmatpush1.bf16.msra.mxu0 %v855_v11  ;;  %770 = vmatpush1.bf16.msra.mxu1 %v855_v11 }
  0x25   : > { %495 = vmatprep.subr.bf16.mxu0 %v856_v12  ;;  %755 = vmatprep.subr.bf16.mxu1 %v856_v12  ;;  %p901_p0 = pneg %p900_p13  ;;  %p907_p3 = por %p906_p2, %p905_p1 }
  0x27   : > { %p908_p5 = pnand %p907_p3, %p901_p0 }
  0x28   : > { %496 = vmatpush1.bf16.msra.mxu0 %v858_v14  ;;  %771 = vmatpush1.bf16.msra.mxu1 %v858_v14 }
  0x29   : > { %497 = vmatprep.subr.bf16.mxu0 %v859_v16  ;;  %756 = vmatprep.subr.bf16.mxu1 %v859_v16 }
  0x2c   : > { %498 = vmatpush1.bf16.msra.mxu0 %v861_v17  ;;  %772 = vmatpush1.bf16.msra.mxu1 %v861_v17 }
  0x2d   : > { %499 = vmatprep.subr.bf16.mxu0 %v862_v18  ;;  %757 = vmatprep.subr.bf16.mxu1 %v862_v18 }
  0x30   : > { %500 = vmatpush1.bf16.msra.mxu0 %v864_v19  ;;  %773 = vmatpush1.bf16.msra.mxu1 %v864_v19 }
  0x31   : > { %501 = vmatprep.subr.bf16.mxu0 %v865_v20  ;;  %758 = vmatprep.subr.bf16.mxu1 %v865_v20 }
  0x34   : > { %502 = vmatpush1.bf16.msra.mxu0 %v867_v21  ;;  %774 = vmatpush1.bf16.msra.mxu1 %v867_v21 }
  0x35   : > { %503 = vmatprep.subr.bf16.mxu0 %v868_v22  ;;  %759 = vmatprep.subr.bf16.mxu1 %v868_v22 }
  0x38   : > { %504 = vmatpush1.bf16.msra.mxu0 %v870_v23  ;;  %775 = vmatpush1.bf16.msra.mxu1 %v870_v23 }
  0x39   : > { %505 = vmatprep.subr.bf16.mxu0 %v871_v24  ;;  %760 = vmatprep.subr.bf16.mxu1 %v871_v24 }
  0x3c   : > { %506 = vmatpush1.bf16.msra.mxu0 %v873_v25  ;;  %776 = vmatpush1.bf16.msra.mxu1 %v873_v25 }
  0x3d   : > { %507 = vmatprep.subr.bf16.mxu0 %v874_v26  ;;  %761 = vmatprep.subr.bf16.mxu1 %v874_v26 }
  0x40   : > { %508 = vmatpush1.bf16.msra.mxu0 %v876_v27  ;;  %777 = vmatpush1.bf16.msra.mxu1 %v876_v27 }
  0x41   : > { %509 = vmatprep.subr.bf16.mxu0 %v877_v28  ;;  %762 = vmatprep.subr.bf16.mxu1 %v877_v28 }
  0x44   : > { %510 = vmatpush1.bf16.msra.mxu0 %v879_v29  ;;  %778 = vmatpush1.bf16.msra.mxu1 %v879_v29 }
  0x45   : > { %511 = vmatprep.subr.bf16.mxu0 %v880_v30  ;;  %763 = vmatprep.subr.bf16.mxu1 %v880_v30 }
  0x48   : > { %512 = vmatpush1.bf16.msra.mxu0 %v882_v31  ;;  %779 = vmatpush1.bf16.msra.mxu1 %v882_v31 }
  0x49   : > { %513 = vmatprep.subr.bf16.mxu0 %v883_v32  ;;  %764 = vmatprep.subr.bf16.mxu1 %v883_v32 }
  0x4c   : > { %514 = vmatpush1.bf16.msra.mxu0 %v885_v33  ;;  %780 = vmatpush1.bf16.msra.mxu1 %v885_v33 }
  0x4f   : > { %516 = vmatmul.mubr.bf16.vlgmr.msra.gmra.mrb[0].mxu0 %v886_v34  ;;  %536 = vmatmul.mubr.bf16.vlgmr.msra.gmra.mrb[0].mxu1 %v889_v35 }
  0x50   : > { %525 = vmatprep.mubr.bf16.mxu0 %v892_v36  ;;  %545 = vmatprep.mubr.bf16.mxu1 %v894_v37 }
  0x57   : > { %526 = vmatmul.mubr.bf16.gmra.mrb[4].mxu0 %v896_v38  ;;  %546 = vmatmul.mubr.bf16.gmra.mrb[4].mxu1 %v897_v39 }
 0x122   : > { %v517_v47 = vpop.f32.mrb[0].mxu0  ;;  %v537_v48 = vpop.f32.mrb[0].mxu1 }
 0x123   : > { %v518_v49 = vadd.f32 %v517_v47, %v276_v45  ;;  %v538_v50 = vadd.f32 %v537_v48, %v276_v45  ;;  %v519_v51 = vpop.f32.mrb[1].mxu0  ;;  %v539_v52 = vpop.f32.mrb[1].mxu1 }
 0x124   : > { %v520_v53 = vadd.f32 %v519_v51, %v280_v46  ;;  %v540_v54 = vadd.f32 %v539_v52, %v280_v46  ;;  %v521_v55 = vpop.f32.mrb[2].mxu0  ;;  %v541_v56 = vpop.f32.mrb[2].mxu1 }
 0x125   : > { %556 = vst [vmem:[%s1172_s11] sm:$0xff] %v518_v49  ;;  %564 = vst [vmem:[%s1172_s11 + $0x40] sm:$0xff] %v538_v50  ;;  %v522_v57 = vadd.f32 %v521_v55, %v276_v45  ;;  %v542_v58 = vadd.f32 %v541_v56, %v276_v45  ;;  %v523_v59 = vpop.f32.mrb[3].mxu0  ;;  %v543_v60 = vpop.f32.mrb[3].mxu1 }
 0x126   : > { %557 = vst [vmem:[%s1172_s11 + $0x8] sm:$0xff] %v520_v53  ;;  %565 = vst [vmem:[%s1172_s11 + $0x48] sm:$0xff] %v540_v54  ;;  %v524_v61 = vadd.f32 %v523_v59, %v280_v46  ;;  %v544_v62 = vadd.f32 %v543_v60, %v280_v46 }
 0x127   : > { %558 = vst [vmem:[%s1172_s11 + $0x10] sm:$0xff] %v522_v57  ;;  %566 = vst [vmem:[%s1172_s11 + $0x50] sm:$0xff] %v542_v58 }
 0x128   : > { %559 = vst [vmem:[%s1172_s11 + $0x18] sm:$0xff] %v524_v61  ;;  %567 = vst [vmem:[%s1172_s11 + $0x58] sm:$0xff] %v544_v62 }
 0x12a   : > { %v527_v63 = vpop.f32.mrb[4].mxu0  ;;  %v547_v0 = vpop.f32.mrb[4].mxu1 }
 0x12b   : > { %v528_v1 = vadd.f32 %v527_v63, %v276_v45  ;;  %v548_v2 = vadd.f32 %v547_v0, %v276_v45  ;;  %v529_v3 = vpop.f32.mrb[5].mxu0  ;;  %v549_v4 = vpop.f32.mrb[5].mxu1 }
 0x12c   : > { %v530_v5 = vadd.f32 %v529_v3, %v280_v46  ;;  %v550_v6 = vadd.f32 %v549_v4, %v280_v46  ;;  %v531_v7 = vpop.f32.mrb[6].mxu0  ;;  %v551_v8 = vpop.f32.mrb[6].mxu1 }
 0x12d   : > { %560 = vst [vmem:[%s1172_s11 + $0x20] sm:$0xff] %v528_v1  ;;  %568 = vst [vmem:[%s1172_s11 + $0x60] sm:$0xff] %v548_v2  ;;  %v532_v9 = vadd.f32 %v531_v7, %v276_v45  ;;  %v552_v10 = vadd.f32 %v551_v8, %v276_v45  ;;  %v533_v11 = vpop.f32.mrb[7].mxu0  ;;  %v553_v12 = vpop.f32.mrb[7].mxu1 }
 0x12e   : > { %561 = vst [vmem:[%s1172_s11 + $0x28] sm:$0xff] %v530_v5  ;;  %569 = vst [vmem:[%s1172_s11 + $0x68] sm:$0xff] %v550_v6  ;;  %v534_v13 = vadd.f32 %v533_v11, %v280_v46  ;;  %v554_v14 = vadd.f32 %v553_v12, %v280_v46 }
 0x12f   : > { %562 = vst [vmem:[%s1172_s11 + $0x30] sm:$0xff] %v532_v9  ;;  %570 = vst [vmem:[%s1172_s11 + $0x70] sm:$0xff] %v552_v10 }
 0x130   : > { %563 = vst [vmem:[%s1172_s11 + $0x38] sm:$0xff] %v534_v13  ;;  %571 = vst [vmem:[%s1172_s11 + $0x78] sm:$0xff] %v554_v14 }
 0x131   : > { %911 = shalt.err (!%p908_p5)
}
 0x132   : > { %s912_s26 = scalar_lea.hbm %s1189_s10, 2048  ;;  %s916_s29 = scalar_lea.hbm %s1250_s3, 4096 }
 0x133   : > { %p913_p6 = scmp.ne.s32.totalorder %s1189_s10, %s912_s26  ;;  %p917_p10 = scmp.lt.u32.totalorder %s1189_s10, %s1250_s3 }
 0x134   : > { %p918_p11 = scmp.lt.u32.totalorder %s916_s29, %s912_s26  ;;  %p920_p13 = scmp.lt.u32.totalorder %s912_s26, %s1189_s10 }
 0x135   : > { %p914_p7 = pnand %p913_p6, %p1041_p4 }
 0x136   : > { %p919_p12 = por %p918_p11, %p917_p10 }
 0x137   : > { %p915_p9 = pneg %p914_p7 }
 0x138   : > { %p921_p0 = por %p920_p13, %p919_p12 }
 0x13a   : > { %p922_p1 = pnand %p921_p0, %p915_p9 }
 0x13c   : > { %925 = shalt.err (!%p922_p1)
}
 0x13d   : > { %s979_s5 = smov 256   ;;  %s980_s11 = smov 16  }
 0x13e   : > { %781 = dma.vmem_to_hbm [thread:$0]  (%p1041_p4), %s1191_s7, 2048, %s1189_s10, %s1201_s18, %s979_s5, %s979_s5, %s980_s11  }
 0x13f PF: > { %p787_p2 = scmp.ge.s32.totalorder %s976_s17, 2  ;;  %s604_s6 = sand.u32 1, %s956_s12  }
 0x140   : > { %s605_s15 = scalar_lea.sflag [#allocation3], %s604_s6 }
 0x141   : > { %p784_p3 = pnand %p787_p2, %p1048_p8 }
 0x143   : > { %951 = dma.done.wait (!%p784_p3), %s605_s15, 2048  }
 0x144   : > { %953 = vsyncadd (!%p784_p3), %s605_s15, 4294965248  ;;  %s16_s17 = sadd.s32 1, %s976_s17   ;;  %s1253_s12 = smov %s960_s13 }
 0x145   : > { %p13_p5 = scmp.ge.s32.totalorder %s16_s17, 4   ;;  %s1254_s13 = smov %s964_s14 }
 0x146   : > { %s1255_s14 = smov %s1054_s25  ;;  %s1256_s15 = smov %s972_s16 }
 0x147   : > { %s1257_s16 = smov %s1259_s20  ;;  %15 = sbr.rel (!%p13_p5) target bundleno = 4 (0x4), region = 73 }
 0x14e   :  { %610 = vsyncpa [#allocation3], 1 }
 0x14f   :  { %612 = vsyncpa [#allocation3 + $0x1], 1 }

</bundles_post_ra>
